<compile_context>
chip_gen: v5e
topology: v5e:2x2
jax: 0.10.0
libtpu: 0.0.40
codegen_flags: <defaults>
</compile_context>

<pallas_src>
import functools

import jax
import jax.numpy as jnp
import numpy as np
from jax.experimental import pallas as pl
from jax.experimental.pallas import tpu as pltpu


def _round_up(x, m):
    return ((x + m - 1) // m) * m


def _weighted_linear_kernel(x_ref, w_ref, b_ref, o_ref, acc_ref, *,
                            scale, compute_dtype):
    k = pl.program_id(2)

    @pl.when(k == 0)
    def _():
        acc_ref[...] = jnp.zeros_like(acc_ref)

    x = x_ref[...]
    w = w_ref[...]
    if compute_dtype is not None:
        x = x.astype(compute_dtype)
        w = w.astype(compute_dtype)
    acc_ref[...] += jnp.dot(x, w, preferred_element_type=jnp.float32)

    @pl.when(k == pl.num_programs(2) - 1)
    def _():
        # Equalized-LR scale on the f32 accumulator (cheaper than scaling the
        # x tile), fused with the bias add; single cast to the output dtype.
        o_ref[...] = (acc_ref[...] * scale + b_ref[...]).astype(o_ref.dtype)


def weighted_linear(x, weight, bias, gain=2.0, *,
                    tm_max=256, tn_max=256, tk_max=512,
                    compute_dtype=None):
    """ProGAN WeightedLinear forward.

    x:      (M, K) activations
    weight: (N, K) torch-style nn.Linear weight
    bias:   (N,)
    returns (M, N) = (x * scale) @ weight.T + bias, scale = gain*sqrt(2/K)
    """
    M, K = x.shape
    N, K2 = weight.shape
    assert K == K2 and bias.shape == (N,)

    scale = float(gain * np.sqrt(2.0 / K))

    # Tile sizes: large MXU-friendly tiles, clamped to the (aligned) problem.
    tm = min(tm_max, _round_up(M, 8))      # sublane-aligned rows
    tn = min(tn_max, _round_up(N, 128))    # lane-dense output stores
    tk = min(tk_max, _round_up(K, 128))    # lane-aligned x tile / sublane w

    Mp = _round_up(M, tm)
    Np = _round_up(N, tn)
    Kp = _round_up(K, tk)

    # Zero padding is exact for the matmul; padded rows/cols sliced off below.
    # Weight is pre-transposed once to (K, N) so the kernel does x @ W.
    x_p = jnp.pad(x, ((0, Mp - M), (0, Kp - K)))
    w_p = jnp.pad(weight.T, ((0, Kp - K), (0, Np - N)))
    b_p = jnp.pad(bias, (0, Np - N)).reshape(1, Np)

    kernel = functools.partial(_weighted_linear_kernel, scale=scale,
                               compute_dtype=compute_dtype)

    grid = (Mp // tm, Np // tn, Kp // tk)

    out_p = pl.pallas_call(
        kernel,
        out_shape=jax.ShapeDtypeStruct((Mp, Np), x.dtype),
        grid_spec=pltpu.PrefetchScalarGridSpec(
            num_scalar_prefetch=0,
            grid=grid,
            in_specs=[
                pl.BlockSpec((tm, tk), lambda i, j, k: (i, k)),   # x tile
                pl.BlockSpec((tk, tn), lambda i, j, k: (k, j)),   # weight tile
                pl.BlockSpec((1, tn), lambda i, j, k: (0, j)),    # bias row
            ],
            out_specs=pl.BlockSpec((tm, tn), lambda i, j, k: (i, j)),
            scratch_shapes=[pltpu.VMEM((tm, tn), jnp.float32)],
        ),
        compiler_params=pltpu.CompilerParams(
            dimension_semantics=("parallel", "parallel", "arbitrary"),
            vmem_limit_bytes=48 * 1024 * 1024,   # safe on v7x's 64 MiB VMEM
        ),
        cost_estimate=pl.CostEstimate(
            flops=2 * M * N * K,
            transcendentals=0,
            bytes_accessed=(M * K + K * N + M * N + N) * x.dtype.itemsize,
        ),
    )(x_p, w_p, b_p)

    return out_p[:M, :N]


if __name__ == "__main__":
    key = jax.random.PRNGKey(0)
    k1, k2, k3, k4, k5 = jax.random.split(key, 5)

    # --- Check 1: shapes consistent with the module (batch=16, in=32, out=64),
    #     bias initialized to zero as in __init__. Single-block grid (1,1,1).
    batch, in_features, out_features = 16, 32, 64
    gain = 2.0
    x = jax.random.normal(k1, (batch, in_features), dtype=jnp.float32)
    weight = jax.random.normal(k2, (out_features, in_features), dtype=jnp.float32)
    bias = jnp.zeros((out_features,), dtype=jnp.float32)

    out = jax.block_until_ready(weighted_linear(x, weight, bias, gain=gain))
    scale = gain * np.sqrt(2.0 / in_features)
    ref = (x * scale) @ weight.T + bias
    np.testing.assert_allclose(np.asarray(out), np.asarray(ref),
                               rtol=1e-5, atol=1e-5)

    # --- Check 2: non-tile-divisible shapes + multi-step (3,3,3) grid to
    #     exercise padding/remainder handling and the K-reduction accumulator.
    M2, K2_, N2 = 300, 640, 384
    x2 = jax.random.normal(k3, (M2, K2_), dtype=jnp.float32)
    w2 = jax.random.normal(k4, (N2, K2_), dtype=jnp.float32)
    b2 = jax.random.normal(k5, (N2,), dtype=jnp.float32)

    out2 = jax.block_until_ready(
        weighted_linear(x2, w2, b2, gain=gain,
                        tm_max=128, tn_max=128, tk_max=256))
    scale2 = gain * np.sqrt(2.0 / K2_)
    ref2 = (x2 * scale2) @ w2.T + b2
    np.testing.assert_allclose(np.asarray(out2), np.asarray(ref2),
                               rtol=1e-4, atol=1e-4)

    print("KERNEL_OK")
</pallas_src>

<mosaic_0001>
module attributes {stable_mosaic.version = 11 : i64} {
  func.func @_weighted_linear_kernel(%arg0: i32, %arg1: i32, %arg2: i32, %arg3: memref<16x128xf32, #tpu.memory_space<vmem>>, %arg4: memref<128x128xf32, #tpu.memory_space<vmem>>, %arg5: memref<1x128xf32, #tpu.memory_space<vmem>>, %arg6: memref<16x128xf32, #tpu.memory_space<vmem>>, %arg7: memref<16x128xf32, #tpu.memory_space<vmem>>) attributes {dimension_semantics = [#tpu.dimension_semantics<parallel>, #tpu.dimension_semantics<parallel>, #tpu.dimension_semantics<arbitrary>], iteration_bounds = array<i64: 1, 1, 1>, scalar_prefetch = 0 : i64, scratch_operands = 1 : i64, tpu.core_type = #tpu.core_type<tc>, window_params = [{transform_indices = @transform_0, window_bounds = array<i64: 16, 128>}, {transform_indices = @transform_1, window_bounds = array<i64: 128, 128>}, {transform_indices = @transform_2, window_bounds = array<i64: 1, 128>}, {transform_indices = @transform_3, window_bounds = array<i64: 16, 128>}]} {
    %c0_i32 = arith.constant 0 : i32
    %0 = arith.cmpi eq, %arg2, %c0_i32 : i32
    %1 = arith.extui %0 : i1 to i32
    %c0_i32_0 = arith.constant 0 : i32
    %2 = arith.cmpi ne, %1, %c0_i32_0 : i32
    scf.if %2 {
      %cst_10 = arith.constant 0.000000e+00 : f32
      %12 = vector.broadcast %cst_10 : f32 to vector<16x128xf32>
      %c0_11 = arith.constant 0 : index
      %c0_12 = arith.constant 0 : index
      %13 = vector.load %arg7[%c0_11, %c0_12] : memref<16x128xf32, #tpu.memory_space<vmem>>, vector<16x128xf32>
      tpu.vector_store %arg7[%c0_11, %c0_12], %12 {strides = array<i32>} : memref<16x128xf32, #tpu.memory_space<vmem>>, vector<16x128xf32>,
    } else {
    }
    %c0 = arith.constant 0 : index
    %c0_1 = arith.constant 0 : index
    %3 = vector.load %arg3[%c0, %c0_1] : memref<16x128xf32, #tpu.memory_space<vmem>>, vector<16x128xf32>
    %c0_2 = arith.constant 0 : index
    %c0_3 = arith.constant 0 : index
    %4 = vector.load %arg4[%c0_2, %c0_3] : memref<128x128xf32, #tpu.memory_space<vmem>>, vector<128x128xf32>
    %c0_4 = arith.constant 0 : index
    %c0_5 = arith.constant 0 : index
    %5 = vector.load %arg7[%c0_4, %c0_5] : memref<16x128xf32, #tpu.memory_space<vmem>>, vector<16x128xf32>
    %cst = arith.constant dense<0.000000e+00> : vector<16x128xf32>
    %6 = tpu.matmul %3, %4, %cst {dimension_numbers = #tpu.dot_dimension_numbers<[1], [0], [0], [1], [0, 0, 1, 1], [], []>} : vector<16x128xf32>, vector<128x128xf32>, vector<16x128xf32> -> vector<16x128xf32>
    %7 = arith.addf %5, %6 : vector<16x128xf32>
    %c0_6 = arith.constant 0 : index
    %c0_7 = arith.constant 0 : index
    %8 = vector.load %arg7[%c0_6, %c0_7] : memref<16x128xf32, #tpu.memory_space<vmem>>, vector<16x128xf32>
    tpu.vector_store %arg7[%c0_6, %c0_7], %7 {strides = array<i32>} : memref<16x128xf32, #tpu.memory_space<vmem>>, vector<16x128xf32>,
    %c0_i32_8 = arith.constant 0 : i32
    %9 = arith.cmpi eq, %arg2, %c0_i32_8 : i32
    %10 = arith.extui %9 : i1 to i32
    %c0_i32_9 = arith.constant 0 : i32
    %11 = arith.cmpi ne, %10, %c0_i32_9 : i32
    scf.if %11 {
      %c0_10 = arith.constant 0 : index
      %c0_11 = arith.constant 0 : index
      %12 = vector.load %arg7[%c0_10, %c0_11] : memref<16x128xf32, #tpu.memory_space<vmem>>, vector<16x128xf32>
      %cst_12 = arith.constant 5.000000e-01 : f32
      %13 = vector.broadcast %cst_12 : f32 to vector<16x128xf32>
      %14 = arith.mulf %12, %13 : vector<16x128xf32>
      %c0_13 = arith.constant 0 : index
      %c0_14 = arith.constant 0 : index
      %15 = vector.load %arg5[%c0_13, %c0_14] : memref<1x128xf32, #tpu.memory_space<vmem>>, vector<1x128xf32>
      %16 = vector.broadcast %15 : vector<1x128xf32> to vector<16x128xf32>
      %17 = arith.addf %14, %16 : vector<16x128xf32>
      %c0_15 = arith.constant 0 : index
      %c0_16 = arith.constant 0 : index
      %18 = vector.load %arg6[%c0_15, %c0_16] : memref<16x128xf32, #tpu.memory_space<vmem>>, vector<16x128xf32>
      tpu.vector_store %arg6[%c0_15, %c0_16], %17 {strides = array<i32>} : memref<16x128xf32, #tpu.memory_space<vmem>>, vector<16x128xf32>,
    } else {
    }
    return
  }
  func.func @transform_0(%arg0: i32, %arg1: i32, %arg2: i32) -> (i32, i32) {
    %c0_i32 = arith.constant 0 : i32
    return %arg0, %arg2 : i32, i32
  }
  func.func @transform_1(%arg0: i32, %arg1: i32, %arg2: i32) -> (i32, i32) {
    %c0_i32 = arith.constant 0 : i32
    return %arg2, %arg1 : i32, i32
  }
  func.func @transform_2(%arg0: i32, %arg1: i32, %arg2: i32) -> (i32, i32) {
    %c0_i32 = arith.constant 0 : i32
    %c0_i32_0 = arith.constant 0 : i32
    return %c0_i32, %arg1 : i32, i32
  }
  func.func @transform_3(%arg0: i32, %arg1: i32, %arg2: i32) -> (i32, i32) {
    %c0_i32 = arith.constant 0 : i32
    return %arg0, %arg1 : i32, i32
  }
}

</mosaic_0001>

<bundles_post_ra>
// kernel: tpu_custom_call.1
= control target key start
LH: loop header
LB: loop body
LE: loop exit
PB: predicated region body
PF: predicated region fallthrough
CT: control target
= control target key end

     0   :  { %8 = vsyncpa [#allocation4], 0  ;;  %s281_s0 = inlined_call_operand.hbm [shape: f32[16,128], index: 0, kind: input, shape index: {}]   ;;  %s282_s1 = inlined_call_operand.hbm [shape: f32[128,128], index: 1, kind: input, shape index: {}]   ;;  %s283_s2 = inlined_call_operand.vmem [shape: f32[1,128], index: 2, kind: input, shape index: {}]   ;;  %s284_s3 = inlined_call_operand.hbm [shape: f32[16,128], index: 3, kind: output, shape index: {}]  }
   0x1   :  { %9 = vsyncpa [#allocation7], 0 }
   0x2   :  { %10 = vsyncpa [#allocation5], 0  ;;  %s15_s14 = sshll.u32 %s281_s0, 4  ;;  %s235_s15 = smov [#allocation3]   ;;  %s16_s14 = int_to_ptr.hbm [resolvable:$true] %s15_s14 }
   0x3   :  { %s17_s16 = sshll.u32 %s235_s15, 4  ;;  %s28_s19 = sshll.u32 %s282_s1, 4  ;;  %s18_s16 = int_to_ptr.vmem [resolvable:$true] %s17_s16  ;;  %s29_s19 = int_to_ptr.hbm [resolvable:$true] %s28_s19 }
   0x4   :  { %s236_s20 = smov 128   ;;  %s237_s21 = smov 8  }
   0x5   :  { %23 = dma.hbm_to_vmem [thread:$0]  %s16_s14, 256, %s18_s16, [#allocation4], %s236_s20, %s236_s20, %s237_s21  }
   0x6   :  { %s238_s22 = smov [#allocation6]  }
   0x7   :  { %s30_s23 = sshll.u32 %s238_s22, 4  ;;  %s31_s23 = int_to_ptr.vmem [resolvable:$true] %s30_s23 }
   0x8   :  { %36 = dma.hbm_to_vmem [thread:$0]  %s29_s19, 2048, %s31_s23, [#allocation7], %s236_s20, %s236_s20, %s237_s21  }
   0x9   :  { %229 = dma.done.wait [#allocation4], 256  }
   0xa   :  { %230 = vsyncadd [#allocation4], 4294967040 }
   0xb   :  { %231 = dma.done.wait [#allocation7], 2048  }
   0xc   :  { %232 = vsyncadd [#allocation7], 4294965248  ;;  %v70_v0 = vld [vmem:[#allocation6 + $0x78] sm:$0xff]  ;;  %v69_v1 = vld [vmem:[#allocation6 + $0x70] sm:$0xff]  ;;  %s239_s24 = smov [#allocation8]   ;;  %s121_s28 = sshll.u32 %s284_s3, 4  ;;  %s122_s28 = int_to_ptr.hbm [resolvable:$true] %s121_s28 }
   0xd   :  { %73 = vmatpush.msra.mxu0 %v70_v0  ;;  %135 = vmatpush.msra.mxu1 %v70_v0  ;;  %v68_v2 = vld [vmem:[#allocation6 + $0x68] sm:$0xff]  ;;  %v67_v3 = vld [vmem:[#allocation6 + $0x60] sm:$0xff]  ;;  %v66_v4 = vld [vmem:[#allocation6 + $0x58] sm:$0xff]  ;;  %s119_s25 = sshll.u32 %s239_s24, 4  ;;  %s120_s25 = int_to_ptr.vmem [resolvable:$true] %s119_s25 }
   0xe   :  { %v65_v5 = vld [vmem:[#allocation6 + $0x50] sm:$0xff]  ;;  %v64_v6 = vld [vmem:[#allocation6 + $0x48] sm:$0xff]  ;;  %v63_v7 = vld [vmem:[#allocation6 + $0x40] sm:$0xff] }
   0xf   :  { %74 = vmatpush.msra.mxu0 %v69_v1  ;;  %136 = vmatpush.msra.mxu1 %v69_v1  ;;  %v62_v8 = vld [vmem:[#allocation6 + $0x38] sm:$0xff]  ;;  %v61_v9 = vld [vmem:[#allocation6 + $0x30] sm:$0xff]  ;;  %v60_v10 = vld [vmem:[#allocation6 + $0x28] sm:$0xff] }
  0x10   :  { %v59_v11 = vld [vmem:[#allocation6 + $0x20] sm:$0xff]  ;;  %v58_v12 = vld [vmem:[#allocation6 + $0x18] sm:$0xff]  ;;  %v57_v13 = vld [vmem:[#allocation6 + $0x10] sm:$0xff] }
  0x11   :  { %75 = vmatpush.msra.mxu0 %v68_v2  ;;  %137 = vmatpush.msra.mxu1 %v68_v2  ;;  %v56_v14 = vld [vmem:[#allocation6 + $0x8] sm:$0xff]  ;;  %v55_v15 = vld [vmem:[#allocation6] sm:$0xff]  ;;  %v53_v16 = vld [vmem:[#allocation3] sm:$0xff] }
  0x12   :  { %v54_v17 = vld [vmem:[#allocation3 + $0x8] sm:$0xff]  ;;  %v156_v18 = vld [vmem:[%s283_s2] ss:$0 sm:$0xff] }
  0x13   :  { %76 = vmatpush.msra.mxu0 %v67_v3  ;;  %138 = vmatpush.msra.mxu1 %v67_v3 }
  0x15   :  { %77 = vmatpush.msra.mxu0 %v66_v4  ;;  %139 = vmatpush.msra.mxu1 %v66_v4 }
  0x17   :  { %78 = vmatpush.msra.mxu0 %v65_v5  ;;  %140 = vmatpush.msra.mxu1 %v65_v5 }
  0x19   :  { %79 = vmatpush.msra.mxu0 %v64_v6  ;;  %141 = vmatpush.msra.mxu1 %v64_v6 }
  0x1b   :  { %80 = vmatpush.msra.mxu0 %v63_v7  ;;  %142 = vmatpush.msra.mxu1 %v63_v7 }
  0x1d   :  { %81 = vmatpush.msra.mxu0 %v62_v8  ;;  %143 = vmatpush.msra.mxu1 %v62_v8 }
  0x1f   :  { %82 = vmatpush.msra.mxu0 %v61_v9  ;;  %144 = vmatpush.msra.mxu1 %v61_v9 }
  0x21   :  { %83 = vmatpush.msra.mxu0 %v60_v10  ;;  %145 = vmatpush.msra.mxu1 %v60_v10 }
  0x23   :  { %84 = vmatpush.msra.mxu0 %v59_v11  ;;  %146 = vmatpush.msra.mxu1 %v59_v11 }
  0x25   :  { %85 = vmatpush.msra.mxu0 %v58_v12  ;;  %147 = vmatpush.msra.mxu1 %v58_v12 }
  0x27   :  { %86 = vmatpush.msra.mxu0 %v57_v13  ;;  %148 = vmatpush.msra.mxu1 %v57_v13 }
  0x29   :  { %87 = vmatpush.msra.mxu0 %v56_v14  ;;  %149 = vmatpush.msra.mxu1 %v56_v14 }
  0x2b   :  { %88 = vmatpush.msra.mxu0 %v55_v15  ;;  %150 = vmatpush.msra.mxu1 %v55_v15 }
  0x2c   :  { %89 = vmatmul.f32.vlgmr.msra.gmra.mxu0 %v53_v16  ;;  %92 = vmatmul.f32.vlgmr.msra.gmra.mxu1 %v54_v17 }
  0xa9   :  { %v90_v19 = vpop.f32.mrf.mxu0  ;;  %v93_v20 = vpop.f32.mrf.mxu1 }
  0xaa   :  { %v105_v21 = vmul.f32 0.5, %v90_v19  ;;  %v106_v22 = vmul.f32 0.5, %v93_v20 }
  0xac   :  { %v111_v23 = vadd.f32 %v156_v18, %v105_v21  ;;  %v112_v24 = vadd.f32 %v156_v18, %v106_v22 }
  0xae   :  { %113 = vst [vmem:[#allocation8] sm:$0xff] %v111_v23 }
  0xaf   :  { %114 = vst [vmem:[#allocation8 + $0x8] sm:$0xff] %v112_v24 }
  0xb0   :  { %127 = dma.vmem_to_hbm [thread:$0]  %s120_s25, 256, %s122_s28, [#allocation5], %s236_s20, %s236_s20, %s237_s21  }
  0xb1   :  { %233 = dma.done.wait [#allocation5], 256  }
  0xb2   :  { %234 = vsyncadd [#allocation5], 4294967040 }
  0xb3   :  { %132 = vsyncpa [#allocation4], 1 }
  0xb4   :  { %133 = vsyncpa [#allocation7], 1 }
  0xb5   :  { %134 = vsyncpa [#allocation5], 1 }

</bundles_post_ra>
